<compile_context>
chip_gen: v7x
topology: tpu7x:2x2x1
jax: 0.10.0
libtpu: 0.0.40
codegen_flags: <defaults>
</compile_context>

<pallas_src>
import math

import jax
import jax.numpy as jnp
from jax.experimental import pallas as pl
from jax.experimental.pallas import tpu as pltpu


LANE = 128          # lane width; hidden dim is padded to a multiple of this
SUBLANE = 8         # sublane width; w2 rows / batch tiles padded to this


def _round_up(n, m):
    return (n + m - 1) // m * m


def mlp_kernel(x_ref, w1_ref, b1_ref, w2_ref, b2_ref, o_ref):
    # Layer 1 on the MXU: (TB, dim) @ (dim, Hp) -> (TB, Hp), Hp lane-aligned.
    h = jnp.dot(x_ref[...], w1_ref[...], preferred_element_type=jnp.float32)
    # Bias + ReLU on the VPU in f32 (padded columns are relu(0 + 0) = 0).
    h = jnp.maximum(h + b1_ref[...], 0.0)

    # Layer 2 (nout == 1): contract over Hp with w2 held as rows, A @ B^T form.
    # Output comes out directly as (8, TB) with batch on the lane axis; rows
    # 1..7 are zero padding.  This avoids both a badly-shaped (Hp, 1) weight
    # tile and masked (TB, 1) partial stores.
    out = jax.lax.dot_general(
        w2_ref[...], h,
        dimension_numbers=(((1,), (1,)), ((), ())),
        preferred_element_type=jnp.float32)          # (8, TB)

    # b2 is a scalar read from SMEM (essentially free).
    o_ref[...] = (out[0:1, :] + b2_ref[0, 0]).astype(o_ref.dtype)


def nn_forward(x, w1, b1, w2, b2, *, max_batch_tile=1024):
    """Forward pass of the NN module as a single Pallas kernel.

    x  : (B, dim)   float32
    w1 : (dim, H)   float32   (torch layer-0 weight, transposed: in x out)
    b1 : (H,)       float32
    w2 : (nout, H)  float32   (torch layer-1 weight, un-transposed; nout == 1)
    b2 : (nout,)    float32
    returns (B, nout) float32
    """
    B, dim = x.shape
    H = w1.shape[1]
    nout = w2.shape[0]
    assert nout == 1, "kernel specialised for the module default nout=1"
    assert b1.shape == (H,) and w2.shape == (nout, H) and b2.shape == (nout,)

    # --- pad hidden dim to a lane-aligned width (zeros are inert through
    #     bias/ReLU and the final contraction) ---------------------------------
    Hp = _round_up(H, LANE)
    w1p = jnp.pad(w1, ((0, 0), (0, Hp - H)))                     # (dim, Hp)
    b1p = jnp.pad(b1, (0, Hp - H)).reshape(1, Hp)                # (1, Hp)
    w2p = jnp.pad(w2, ((0, SUBLANE - nout), (0, Hp - H)))        # (8, Hp)
    b2p = b2.reshape(1, 1)                                       # (1, 1) -> SMEM

    # --- batch tiling: grid over batch, weights resident across the grid -----
    TB = min(max_batch_tile, _round_up(B, SUBLANE))
    Bp = _round_up(B, TB)
    xp = jnp.pad(x, ((0, Bp - B), (0, 0)))                       # (Bp, dim)
    num_tiles = Bp // TB

    out_row = pl.pallas_call(
        mlp_kernel,
        out_shape=jax.ShapeDtypeStruct((1, Bp), x.dtype),        # lane-dense out
        grid=(num_tiles,),
        in_specs=[
            pl.BlockSpec((TB, dim), lambda i: (i, 0)),           # x: tiled over batch
            pl.BlockSpec((dim, Hp), lambda i: (0, 0)),           # w1: resident
            pl.BlockSpec((1, Hp), lambda i: (0, 0)),             # b1: resident
            pl.BlockSpec((SUBLANE, Hp), lambda i: (0, 0)),       # w2 rows: resident
            pl.BlockSpec(memory_space=pltpu.MemorySpace.SMEM),   # b2 scalar
        ],
        out_specs=pl.BlockSpec((1, TB), lambda i: (0, i)),
        compiler_params=pltpu.CompilerParams(
            dimension_semantics=("parallel",),
            vmem_limit_bytes=32 * 1024 * 1024,
        ),
    )(xp, w1p, b1p, w2p, b2p)

    # Restore the (B, nout) layout expected by the module.
    return out_row[0, :B].reshape(B, nout)


def init_params(key, dim, hidden=50, nout=1):
    """Mirror the torch module init: xavier_uniform_ weights, default torch
    Linear uniform bias init.  Weights returned in the layout nn_forward wants."""
    k1, k2, k3, k4 = jax.random.split(key, 4)
    bw1 = math.sqrt(6.0 / (dim + hidden))
    w1 = jax.random.uniform(k1, (dim, hidden), jnp.float32, -bw1, bw1)
    bb1 = 1.0 / math.sqrt(dim)
    b1 = jax.random.uniform(k2, (hidden,), jnp.float32, -bb1, bb1)
    bw2 = math.sqrt(6.0 / (hidden + nout))
    w2 = jax.random.uniform(k3, (nout, hidden), jnp.float32, -bw2, bw2)
    bb2 = 1.0 / math.sqrt(hidden)
    b2 = jax.random.uniform(k4, (nout,), jnp.float32, -bb2, bb2)
    return (w1, b1), (w2, b2)


if __name__ == "__main__":
    key = jax.random.PRNGKey(0)
    batch, dim, hidden, nout = 8, 16, 50, 1

    key, kx = jax.random.split(key)
    x = jax.random.normal(kx, (batch, dim), jnp.float32)
    (w1, b1), (w2, b2) = init_params(key, dim, hidden=hidden, nout=nout)

    out = nn_forward(x, w1, b1, w2, b2)
    out = jax.block_until_ready(out)

    # Plain-JAX reference (same semantics as the torch module).
    ref = jnp.maximum(x @ w1 + b1[None, :], 0.0) @ w2.T + b2[None, :]
    assert out.shape == (batch, nout)
    assert jnp.allclose(out, ref, atol=1e-4, rtol=1e-4), float(
        jnp.max(jnp.abs(out - ref)))

    print("KERNEL_OK")
</pallas_src>

<mosaic_0001>
module attributes {stable_mosaic.version = 11 : i64} {
  func.func @mlp_kernel(%arg0: i32, %arg1: memref<8x16xf32, #tpu.memory_space<vmem>>, %arg2: memref<16x128xf32, #tpu.memory_space<vmem>>, %arg3: memref<1x128xf32, #tpu.memory_space<vmem>>, %arg4: memref<8x128xf32, #tpu.memory_space<vmem>>, %arg5: memref<1x1xf32, #tpu.memory_space<smem>>, %arg6: memref<1x8xf32, #tpu.memory_space<vmem>>) attributes {dimension_semantics = [#tpu.dimension_semantics<parallel>], iteration_bounds = array<i64: 1>, scalar_prefetch = 0 : i64, scratch_operands = 0 : i64, tpu.core_type = #tpu.core_type<tc>, window_params = [{transform_indices = @transform_0, window_bounds = array<i64: 8, 16>}, {pipeline_mode = #tpu.pipeline_mode<synchronous>, transform_indices = @transform_1, window_bounds = array<i64: 16, 128>}, {pipeline_mode = #tpu.pipeline_mode<synchronous>, transform_indices = @transform_2, window_bounds = array<i64: 1, 128>}, {pipeline_mode = #tpu.pipeline_mode<synchronous>, transform_indices = @transform_3, window_bounds = array<i64: 8, 128>}, {transform_indices = @transform_4, window_bounds = array<i64: 1, 1>}, {transform_indices = @transform_5, window_bounds = array<i64: 1, 8>}]} {
    %c0 = arith.constant 0 : index
    %c0_0 = arith.constant 0 : index
    %0 = vector.load %arg1[%c0, %c0_0] : memref<8x16xf32, #tpu.memory_space<vmem>>, vector<8x16xf32>
    %c0_1 = arith.constant 0 : index
    %c0_2 = arith.constant 0 : index
    %1 = vector.load %arg2[%c0_1, %c0_2] : memref<16x128xf32, #tpu.memory_space<vmem>>, vector<16x128xf32>
    %cst = arith.constant dense<0.000000e+00> : vector<8x128xf32>
    %2 = tpu.matmul %0, %1, %cst {dimension_numbers = #tpu.dot_dimension_numbers<[1], [0], [0], [1], [0, 0, 1, 1], [], []>} : vector<8x16xf32>, vector<16x128xf32>, vector<8x128xf32> -> vector<8x128xf32>
    %c0_3 = arith.constant 0 : index
    %c0_4 = arith.constant 0 : index
    %3 = vector.load %arg3[%c0_3, %c0_4] : memref<1x128xf32, #tpu.memory_space<vmem>>, vector<1x128xf32>
    %4 = vector.broadcast %3 : vector<1x128xf32> to vector<8x128xf32>
    %5 = arith.addf %2, %4 : vector<8x128xf32>
    %cst_5 = arith.constant 0.000000e+00 : f32
    %6 = vector.broadcast %cst_5 : f32 to vector<8x128xf32>
    %7 = arith.maximumf %5, %6 : vector<8x128xf32>
    %c0_6 = arith.constant 0 : index
    %c0_7 = arith.constant 0 : index
    %8 = vector.load %arg4[%c0_6, %c0_7] : memref<8x128xf32, #tpu.memory_space<vmem>>, vector<8x128xf32>
    %cst_8 = arith.constant dense<0.000000e+00> : vector<8x8xf32>
    %9 = tpu.matmul %8, %7, %cst_8 {dimension_numbers = #tpu.dot_dimension_numbers<[1], [1], [0], [0], [0, 0, 1, 0], [], []>} : vector<8x128xf32>, vector<8x128xf32>, vector<8x8xf32> -> vector<8x8xf32>
    %10 = vector.extract_strided_slice %9 {offsets = [0, 0], sizes = [1, 8], strides = [1, 1]} : vector<8x8xf32> to vector<1x8xf32>
    %c0_9 = arith.constant 0 : index
    %c0_10 = arith.constant 0 : index
    %11 = memref.load %arg5[%c0_9, %c0_10] : memref<1x1xf32, #tpu.memory_space<smem>>
    %12 = vector.broadcast %11 : f32 to vector<1x8xf32>
    %13 = arith.addf %10, %12 : vector<1x8xf32>
    %c0_11 = arith.constant 0 : index
    %c0_12 = arith.constant 0 : index
    %14 = vector.load %arg6[%c0_11, %c0_12] : memref<1x8xf32, #tpu.memory_space<vmem>>, vector<1x8xf32>
    tpu.vector_store %arg6[%c0_11, %c0_12], %13 {strides = array<i32>} : memref<1x8xf32, #tpu.memory_space<vmem>>, vector<1x8xf32>,
    return
  }
  func.func @transform_0(%arg0: i32) -> (i32, i32) {
    %c0_i32 = arith.constant 0 : i32
    %c0_i32_0 = arith.constant 0 : i32
    return %arg0, %c0_i32 : i32, i32
  }
  func.func @transform_1(%arg0: i32) -> (i32, i32) {
    %c0_i32 = arith.constant 0 : i32
    %c0_i32_0 = arith.constant 0 : i32
    %c0_i32_1 = arith.constant 0 : i32
    return %c0_i32, %c0_i32_0 : i32, i32
  }
  func.func @transform_2(%arg0: i32) -> (i32, i32) {
    %c0_i32 = arith.constant 0 : i32
    %c0_i32_0 = arith.constant 0 : i32
    %c0_i32_1 = arith.constant 0 : i32
    return %c0_i32, %c0_i32_0 : i32, i32
  }
  func.func @transform_3(%arg0: i32) -> (i32, i32) {
    %c0_i32 = arith.constant 0 : i32
    %c0_i32_0 = arith.constant 0 : i32
    %c0_i32_1 = arith.constant 0 : i32
    return %c0_i32, %c0_i32_0 : i32, i32
  }
  func.func @transform_4(%arg0: i32) -> (i32, i32) {
    %c0_i32 = arith.constant 0 : i32
    %c0_i32_0 = arith.constant 0 : i32
    %c0_i32_1 = arith.constant 0 : i32
    return %c0_i32, %c0_i32_0 : i32, i32
  }
  func.func @transform_5(%arg0: i32) -> (i32, i32) {
    %c0_i32 = arith.constant 0 : i32
    %c0_i32_0 = arith.constant 0 : i32
    return %c0_i32, %arg0 : i32, i32
  }
}

</mosaic_0001>

<bundles_post_ra>
// kernel: tpu_custom_call.1
= control target key start
LH: loop header
LB: loop body
LE: loop exit
PB: predicated region body
PF: predicated region fallthrough
CT: control target
= control target key end

     0   :  { %11 = vsyncpa [#allocation4], 0  ;;  %s417_s0 = inlined_call_operand.hbm [shape: f32[8,16], index: 0, kind: input, shape index: {}]   ;;  %s418_s1 = inlined_call_operand.hbm [shape: f32[16,128], index: 1, kind: input, shape index: {}]   ;;  %s419_s2 = inlined_call_operand.vmem [shape: f32[1,128], index: 2, kind: input, shape index: {}]   ;;  %s420_s3 = inlined_call_operand.vmem [shape: f32[8,128], index: 3, kind: input, shape index: {}]   ;;  %s421_s4 = inlined_call_operand.<no memory space> [shape: f32[1,1], index: 4, kind: input, shape index: {}]   ;;  %s422_s5 = inlined_call_operand.hbm [shape: f32[1,8], index: 5, kind: output, shape index: {}]  }
   0x1   :  { %12 = vsyncpa [#allocation7], 0 }
   0x2   :  { %13 = vsyncpa [#allocation5], 0  ;;  %s327_s18 = smov [#allocation3]   ;;  %s328_s20 = smov [#allocation6]  }
   0x3   :  { %s20_s19 = sshll.u32 %s327_s18, 4  ;;  %s29_s21 = sshll.u32 %s328_s20, 4  ;;  %s21_s19 = int_to_ptr.vmem [resolvable:$true] %s20_s19  ;;  %s365_s21 = int_to_ptr.vmem [resolvable:$true] %s29_s21 }
   0x4   :  { %s255_s24 = scalar_lea.hbm %s417_s0, 128 }
   0x5   :  { %p256_p0 = scmp.ne.s32.totalorder %s417_s0, %s255_s24  ;;  %p259_p1 = scmp.lt.u32.totalorder %s255_s24, %s417_s0 }
   0x7   :  { %p261_p2 = pnand %p259_p1, %p256_p0 }
   0x9   :  { %264 = shalt.err (!%p261_p2)
}
   0xa   :  { %s265_s29 = scalar_lea.vmem %s21_s19, 128  ;;  %p270_p4 = scmp.lt.s32.totalorder %s21_s19, %s21_s19 }
   0xb   :  { %p266_p3 = scmp.ne.s32.totalorder %s21_s19, %s265_s29  ;;  %p271_p5 = scmp.lt.s32.totalorder %s265_s29, %s265_s29 }
   0xd   :  { %p272_p6 = por %p271_p5, %p270_p4 }
   0xf   :  { %p273_p7 = pnand %p272_p6, %p266_p3 }
  0x11   :  { %276 = shalt.err (!%p273_p7)
}
  0x12   :  { %23 = dma.hbm_to_vmem [thread:$0]  %s417_s0, 128, %s21_s19, [#allocation4]  }
  0x13   :  { %s277_s9 = scalar_lea.hbm %s418_s1, 256 }
  0x14   :  { %p278_p8 = scmp.ne.s32.totalorder %s418_s1, %s277_s9  ;;  %p281_p9 = scmp.lt.u32.totalorder %s277_s9, %s418_s1 }
  0x16   :  { %p283_p10 = pnand %p281_p9, %p278_p8 }
  0x18   :  { %286 = shalt.err (!%p283_p10)
}
  0x19   :  { %s287_s14 = scalar_lea.vmem %s365_s21, 256  ;;  %p292_p12 = scmp.lt.s32.totalorder %s365_s21, %s365_s21 }
  0x1a   :  { %p288_p11 = scmp.ne.s32.totalorder %s365_s21, %s287_s14  ;;  %p293_p13 = scmp.lt.s32.totalorder %s287_s14, %s287_s14 }
  0x1c   :  { %p294_p0 = por %p293_p13, %p292_p12 }
  0x1e   :  { %p295_p1 = pnand %p294_p0, %p288_p11 }
  0x20   :  { %298 = shalt.err (!%p295_p1)
}
  0x21   :  { %s329_s0 = smov 128   ;;  %s330_s15 = smov 8  }
  0x22   :  { %35 = dma.hbm_to_vmem [thread:$0]  %s418_s1, 256, %s365_s21, [#allocation7], %s329_s0, %s329_s0, %s330_s15  }
  0x23   :  { %321 = dma.done.wait [#allocation4], 128  }
  0x24   :  { %322 = vsyncadd [#allocation4], 4294967168 }
  0x25   :  { %323 = dma.done.wait [#allocation7], 256  }
  0x26   :  { %324 = vsyncadd [#allocation7], 4294967040  ;;  %v331_v0 = vmov 0.0|0.0   ;;  %vm332_vm0 = vmmov 0   ;;  %v333_v1 = vmov 0.0   ;;  %v49_v2 = vld [vmem:[#allocation6] sm:$0xff]  ;;  %v205_v12 = vstv %s421_s4 }
  0x27   :  { %244 = vmatprep.subr.bf16.mxu0 %v331_v0  ;;  %236 = vmatprep.mubr.msk.f32.mxu0 %vm332_vm0, %v333_v1  ;;  %v50_v3 = vld [vmem:[#allocation6 + $0x8] sm:$0xff]  ;;  %v48_v5 = vld [vmem:[#allocation3] sm:$0xff]  ;;  %vm58_vm1 = vcmask 130048   ;;  %s334_s23 = smov [#allocation8]   ;;  %vm207_vm2 = vcmask 57344  }
  0x28   :  { %239 = vmatprep.subr.mxu1 %v333_v1  ;;  %241 = vmatprep.mubr.msk.f32.mxu1 %vm332_vm0, %v333_v1  ;;  %v245_v4 = vpack.c.bf16 %v50_v3, %v49_v2  ;;  %v225_v6 = vld [vmem:[%s419_s2] ss:$0 sm:$0xff]  ;;  %s215_s24 = sshll.u32 %s334_s23, 4  ;;  %s216_s24 = int_to_ptr.vmem [resolvable:$true] %s215_s24 }
  0x29   :  { %v133_v11 = vld [vmem:[%s420_s3] sm:$0xff]  ;;  %s299_s2 = scalar_lea.vmem %s216_s24, 16  ;;  %s303_s25 = scalar_lea.vmem %s216_s24, 32 }
  0x2a   :  { %246 = vmatpush3.bf16.msra.mxu0 %v245_v4  ;;  %p300_p2 = scmp.ne.s32.totalorder %s216_s24, %s299_s2  ;;  %p304_p3 = scmp.lt.s32.totalorder %s216_s24, %s216_s24 }
  0x2b   :  { %p305_p4 = scmp.lt.s32.totalorder %s303_s25, %s299_s2 }
  0x2d   :  { %237 = vmatmul.mubr.msk.f32.vlgmr.msra.gmra.mrb[0].mxu0 %vm58_vm1, %v48_v5  ;;  %p306_p5 = por %p305_p4, %p304_p3 }
  0x2f   :  { %p307_p6 = pnand %p306_p5, %p300_p2 }
 0x100   :  { %v128_v7 = vpop.f32.mrb[0].mxu0 }
 0x101   :  { %v129_v8 = vadd.f32 %v225_v6, %v128_v7  ;;  %v238_v9 = vpop.f32.mrb[1].mxu0 }
 0x103   :  { %v132_v10 = vmax.f32 %v129_v8, 0.0 }
 0x105   :  { %240 = vmatpush3.xpose.msra.mxu1 %v132_v10 }
 0x108   :  { %242 = vmatmul.mubr.f32.vlgmr.msra.gmra.mrb[0].mxu1 %v133_v11 }
 0x1db   :  { %v200_v13 = vpop.f32.mrb[0].mxu1 }
 0x1dc   :  { %v206_v14 = vadd.f32 %v205_v12, %v200_v13  ;;  %v243_v15 = vpop.f32.mrb[1].mxu1 }
 0x1de   :  { %208 = vst.msk [vmem:[#allocation8] sm:$0x1] %vm207_vm2, %v206_v14 }
 0x1df   :  { %310 = shalt.err (!%p307_p6)
}
 0x1e0   :  { %s311_s4 = scalar_lea.hbm %s422_s5, 16 }
 0x1e1   :  { %p312_p7 = scmp.ne.s32.totalorder %s422_s5, %s311_s4  ;;  %p315_p8 = scmp.lt.u32.totalorder %s311_s4, %s422_s5 }
 0x1e3   :  { %p317_p9 = pnand %p315_p8, %p312_p7 }
 0x1e5   :  { %320 = shalt.err (!%p317_p9)
}
 0x1e6   :  { %218 = dma.vmem_to_hbm [thread:$0]  %s216_s24, 16, %s422_s5, [#allocation5]  }
 0x1e7   :  { %325 = dma.done.wait [#allocation5], 16  }
 0x1e8   :  { %326 = vsyncadd [#allocation5], 4294967280 }
 0x1e9   :  { %222 = vsyncpa [#allocation4], 1 }
 0x1ea   :  { %223 = vsyncpa [#allocation7], 1 }
 0x1eb   :  { %224 = vsyncpa [#allocation5], 1 }

</bundles_post_ra>
